<compile_context>
chip_gen: v6e
topology: v6e:2x2x1
jax: 0.10.0
libtpu: 0.0.40
codegen_flags: <defaults>
</compile_context>

<pallas_src>
import functools

import jax
import jax.numpy as jnp
import numpy as np
from jax.experimental import pallas as pl
from jax.experimental.pallas import tpu as pltpu


# --------------------------------------------------------------------------
# Kernels
# --------------------------------------------------------------------------

def _layer1_kernel(cb_ref, ahat_ref, xw1_ref, xw2b_ref, b1_ref, w2a_ref, m_ref,
                   xw2_out_ref, hg1_ref):
    """Layer-1 GraphConv on one Ahat row tile (grid axis = row tile t).

    ahat_ref : (tm, tw)   bf16  non-zero column band of Ahat rows [t*tm, ...)
    xw1_ref  : (tw, nhid) bf16  matching row band of X @ W1
    xw2b_ref : (tm, nout) f32   row tile of X @ W2[nhid:]
    b1_ref   : (1, nhid)  f32
    w2a_ref  : (nhid, nout) f32
    m_ref    : (G, tm)    f32   mean-readout columns for this row tile
    xw2_out_ref : (tm, nout) bf16   row tile of XW2 = H1 @ W2a + X @ W2b
    hg1_ref  : (1, G, nhid) f32 per-tile pooled H1 partial sum
    """
    del cb_ref  # used only by the index_maps
    h1 = jnp.maximum(
        jnp.dot(ahat_ref[...], xw1_ref[...],
                preferred_element_type=jnp.float32) + b1_ref[...],
        0.0)                                                 # (tm, nhid) f32
    # F.dropout(..., training=False) is the identity in eval mode.
    xw2 = (jnp.dot(h1, w2a_ref[...], preferred_element_type=jnp.float32)
           + xw2b_ref[...])                                  # (tm, nout) f32
    xw2_out_ref[...] = xw2.astype(jnp.bfloat16)
    pooled = jnp.dot(m_ref[...], h1, preferred_element_type=jnp.float32)
    hg1_ref[...] = pooled[None, :, :]


def _layer2_kernel(cb_ref, ahat_ref, xw2_ref, b2_ref, m_ref, hg2_ref):
    """Layer-2 GraphConv on one Ahat row tile.

    ahat_ref : (tm, tw)   bf16  non-zero column band of Ahat rows [t*tm, ...)
    xw2_ref  : (tw, nout) bf16  matching row band of XW2
    """
    del cb_ref
    h2 = jnp.maximum(
        jnp.dot(ahat_ref[...], xw2_ref[...],
                preferred_element_type=jnp.float32) + b2_ref[...],
        0.0)                                                 # (tm, nout) f32
    pooled = jnp.dot(m_ref[...], h2, preferred_element_type=jnp.float32)
    hg2_ref[...] = pooled[None, :, :]


# --------------------------------------------------------------------------
# Host-side planning (tile sizes, column bands, VMEM budget)
# --------------------------------------------------------------------------

def _round_up(x, m):
    return ((x + m - 1) // m) * m


def _vmem_budget_bytes():
    """Per-generation usable VMEM budget (v7x 64 MiB vs v6e/v5e 128 MiB)."""
    cap = 64 * 1024 * 1024  # conservative default (v7x per-core VMEM)
    try:
        info = pltpu.get_tpu_info()
        cap = int(getattr(info, "vmem_capacity_bytes", cap)) or cap
    except Exception:
        pass
    return min((cap * 3) // 4, 100 * 1024 * 1024)


def _plan_bands(graph_sizes, n_nodes, tm):
    """Static column-band width tw + per-row-tile column block indices.

    The batched Ahat is block-diagonal over contiguous per-graph node blocks,
    so the non-zero columns of rows [t*tm, (t+1)*tm) lie in a single band.
    Returns (tw, col_block) with tw a multiple of 128 dividing N (or N itself)
    and [col_block[t]*tw, col_block[t]*tw + tw) covering that band.
    """
    offs = np.concatenate([[0], np.cumsum(np.asarray(graph_sizes, np.int64))])
    assert int(offs[-1]) == n_nodes, "graph_sizes must sum to N"
    n_tiles = n_nodes // tm
    starts = np.empty(n_tiles, np.int64)
    ends = np.empty(n_tiles, np.int64)
    for t in range(n_tiles):
        r0, r1 = t * tm, (t + 1) * tm
        g_lo = int(np.searchsorted(offs, r0, side="right")) - 1
        g_hi = int(np.searchsorted(offs, r1, side="left")) - 1
        starts[t] = offs[g_lo]
        ends[t] = offs[g_hi + 1]
    tw = _round_up(int((ends - starts).max()), 128)
    while tw < n_nodes:
        if n_nodes % tw == 0:
            cb = starts // tw
            if np.all(cb * tw + tw >= ends):
                return int(tw), cb.astype(np.int32)
        tw += 128
    return int(n_nodes), np.zeros(n_tiles, np.int32)


def _footprint_bytes(tm, tw, nhid, nout, n_graphs):
    """Rough per-step VMEM footprint (double-buffered pipeline slabs)."""
    g = n_graphs
    call1 = (2 * tm * tw * 2          # Ahat band (bf16)
             + 2 * tw * nhid * 2      # XW1 band (bf16)
             + 2 * tm * nout * 4      # XW2b rows (f32)
             + 2 * g * tm * 4         # mean-readout columns (f32)
             + 2 * (nhid + nhid * nout + nout) * 4
             + 2 * tm * nout * 2      # XW2 output rows (bf16)
             + 2 * g * nhid * 4)      # hg1 partial
    call2 = (2 * tm * tw * 2
             + 2 * tw * nout * 2
             + 2 * g * tm * 4
             + 2 * nout * 4
             + 2 * g * nout * 4)
    return max(call1, call2)


def _pick_tiles(n_nodes, graph_sizes, nhid, nout, n_graphs, budget, row_tile):
    if row_tile is not None:
        if n_nodes % row_tile != 0 or not (row_tile == n_nodes or row_tile % 128 == 0):
            raise ValueError(f"row_tile={row_tile} must divide N={n_nodes} and "
                             f"be a multiple of 128 (or equal N)")
        cands = [row_tile]
    else:
        cands = [c for c in (2048, 1024, 512, 256, 128)
                 if c <= n_nodes and n_nodes % c == 0]
        if not cands:
            cands = [n_nodes]
    chosen = None
    for tm in cands:                       # descending: first fit = biggest fit
        tw, cb = _plan_bands(graph_sizes, n_nodes, tm)
        fp = _footprint_bytes(tm, tw, nhid, nout, n_graphs)
        chosen = (tm, tw, cb, fp)
        if fp <= budget:
            break
    return chosen


# --------------------------------------------------------------------------
# pallas_call wrappers
# --------------------------------------------------------------------------

@functools.partial(jax.jit, static_argnames=("tm", "tw", "vmem_limit"))
def _from_to_gcn_jit(ahat, x, w1, b1, w2, b2, mean_mat, col_block,
                     *, tm, tw, vmem_limit):
    n_nodes = ahat.shape[0]
    nhid = w1.shape[1]
    nout = w2.shape[1]
    n_graphs = mean_mat.shape[0]
    n_tiles = n_nodes // tm

    x32 = x.astype(jnp.float32)
    # concat(H1, X) @ W2 == H1 @ W2[:nhid] + X @ W2[nhid:]   (exact rewrite)
    w2a = w2[:nhid, :].astype(jnp.float32)
    xw2b = jnp.dot(x32, w2[nhid:, :].astype(jnp.float32),
                   preferred_element_type=jnp.float32)                 # (N, nout) f32
    xw1 = jnp.dot(x32, w1.astype(jnp.float32),
                  preferred_element_type=jnp.float32).astype(jnp.bfloat16)
    ahat_bf = ahat.astype(jnp.bfloat16)
    b1_2d = b1.reshape(1, nhid).astype(jnp.float32)
    b2_2d = b2.reshape(1, nout).astype(jnp.float32)
    mean_f32 = mean_mat.astype(jnp.float32)

    # ---- call 1: layer-1 GraphConv + folded concat/W2 transform + pooled H1 ----
    grid1 = pltpu.PrefetchScalarGridSpec(
        num_scalar_prefetch=1,
        grid=(n_tiles,),
        in_specs=[
            pl.BlockSpec((tm, tw), lambda t, cb: (t, cb[t])),        # Ahat band
            pl.BlockSpec((tw, nhid), lambda t, cb: (cb[t], 0)),      # XW1 band
            pl.BlockSpec((tm, nout), lambda t, cb: (t, 0)),          # XW2b rows
            pl.BlockSpec((1, nhid), lambda t, cb: (0, 0)),           # b1
            pl.BlockSpec((nhid, nout), lambda t, cb: (0, 0)),        # W2[:nhid]
            pl.BlockSpec((n_graphs, tm), lambda t, cb: (0, t)),      # mean cols
        ],
        out_specs=(pl.BlockSpec((tm, nout), lambda t, cb: (t, 0)),           # XW2
                   pl.BlockSpec((1, n_graphs, nhid), lambda t, cb: (t, 0, 0))),
    )
    flops1 = (2 * n_nodes * tw * nhid + 2 * n_nodes * nhid * nout
              + 2 * n_graphs * n_nodes * nhid)
    bytes1 = (n_nodes * tw * 2 + n_tiles * tw * nhid * 2 + n_nodes * nout * 4
              + n_graphs * n_nodes * 4 + (nhid + nhid * nout) * 4
              + n_nodes * nout * 2 + n_tiles * n_graphs * nhid * 4)
    xw2, hg1_part = pl.pallas_call(
        _layer1_kernel,
        out_shape=(jax.ShapeDtypeStruct((n_nodes, nout), jnp.bfloat16),
                   jax.ShapeDtypeStruct((n_tiles, n_graphs, nhid), jnp.float32)),
        grid_spec=grid1,
        compiler_params=pltpu.CompilerParams(
            dimension_semantics=("parallel",),
            vmem_limit_bytes=vmem_limit),
        cost_estimate=pl.CostEstimate(flops=int(flops1), transcendentals=0,
                                      bytes_accessed=int(bytes1)),
    )(col_block, ahat_bf, xw1, xw2b, b1_2d, w2a, mean_f32)

    # ---- call 2: layer-2 GraphConv + pooled H2 ----
    grid2 = pltpu.PrefetchScalarGridSpec(
        num_scalar_prefetch=1,
        grid=(n_tiles,),
        in_specs=[
            pl.BlockSpec((tm, tw), lambda t, cb: (t, cb[t])),        # Ahat band
            pl.BlockSpec((tw, nout), lambda t, cb: (cb[t], 0)),      # XW2 band
            pl.BlockSpec((1, nout), lambda t, cb: (0, 0)),           # b2
            pl.BlockSpec((n_graphs, tm), lambda t, cb: (0, t)),      # mean cols
        ],
        out_specs=pl.BlockSpec((1, n_graphs, nout), lambda t, cb: (t, 0, 0)),
    )
    flops2 = 2 * n_nodes * tw * nout + 2 * n_graphs * n_nodes * nout
    bytes2 = (n_nodes * tw * 2 + n_tiles * tw * nout * 2
              + n_graphs * n_nodes * 4 + nout * 4
              + n_tiles * n_graphs * nout * 4)
    hg2_part = pl.pallas_call(
        _layer2_kernel,
        out_shape=jax.ShapeDtypeStruct((n_tiles, n_graphs, nout), jnp.float32),
        grid_spec=grid2,
        compiler_params=pltpu.CompilerParams(
            dimension_semantics=("parallel",),
            vmem_limit_bytes=vmem_limit),
        cost_estimate=pl.CostEstimate(flops=int(flops2), transcendentals=0,
                                      bytes_accessed=int(bytes2)),
    )(col_block, ahat_bf, xw2, b2_2d, mean_f32)

    # tiny per-tile partial reductions + concat of the two pooled halves
    hg1 = hg1_part.sum(axis=0)
    hg2 = hg2_part.sum(axis=0)
    return jnp.concatenate([hg1, hg2], axis=1)


def from_to_gcn_forward(ahat, x, w1, b1, w2, b2, mean_mat, graph_sizes,
                        *, row_tile=None):
    """Eval-mode forward of From_ToGCN on a batched block-diagonal graph.

    ahat:        (N, N) dense symmetric-normalized adjacency of the batched graph
    x:           (N, nfeat) node features (g.ndata['original'])
    w1, b1:      GraphConv(nfeat, nhid) parameters
    w2, b2:      GraphConv(nhid + nfeat, nout) parameters
    mean_mat:    (G, N) per-graph mean-readout matrix (rows = 1/|V_g| indicators)
    graph_sizes: python sequence of per-graph node counts (contiguous blocks)
    """
    n_nodes, _ = x.shape
    nhid = w1.shape[1]
    nout = w2.shape[1]
    n_graphs = mean_mat.shape[0]

    budget = _vmem_budget_bytes()
    tm, tw, col_block, fp = _pick_tiles(n_nodes, graph_sizes, nhid, nout,
                                        n_graphs, budget, row_tile)
    vmem_limit = int(min(max(2 * fp, 32 * 1024 * 1024), budget))

    return _from_to_gcn_jit(ahat, x, w1, b1, w2, b2, mean_mat,
                            jnp.asarray(col_block, jnp.int32),
                            tm=tm, tw=tw, vmem_limit=vmem_limit)


# --------------------------------------------------------------------------
# References
# --------------------------------------------------------------------------

def _reference_f32(ahat, x, w1, b1, w2, b2, mean_mat):
    h1 = jnp.maximum(ahat @ (x @ w1) + b1, 0.0)
    x2 = jnp.concatenate([h1, x], axis=1)
    h2 = jnp.maximum(ahat @ (x2 @ w2) + b2, 0.0)
    return mean_mat @ jnp.concatenate([h1, h2], axis=1)


def _reference_matched(ahat, x, w1, b1, w2, b2, mean_mat):
    # Same bf16 quantization points as the kernels, f32 accumulation everywhere.
    nhid = w1.shape[1]
    ahat_bf = ahat.astype(jnp.bfloat16)
    xw1 = jnp.dot(x, w1, preferred_element_type=jnp.float32).astype(jnp.bfloat16)
    h1 = jnp.maximum(
        jnp.dot(ahat_bf, xw1, preferred_element_type=jnp.float32) + b1, 0.0)
    xw2 = (jnp.dot(h1, w2[:nhid], preferred_element_type=jnp.float32)
           + jnp.dot(x, w2[nhid:], preferred_element_type=jnp.float32)
           ).astype(jnp.bfloat16)
    h2 = jnp.maximum(
        jnp.dot(ahat_bf, xw2, preferred_element_type=jnp.float32) + b2, 0.0)
    hg1 = jnp.dot(mean_mat, h1, preferred_element_type=jnp.float32)
    hg2 = jnp.dot(mean_mat, h2, preferred_element_type=jnp.float32)
    return jnp.concatenate([hg1, hg2], axis=1)


# --------------------------------------------------------------------------
# Demo / self-test
# --------------------------------------------------------------------------

if __name__ == "__main__":
    # 16 graphs of 16 nodes each (ring graphs, degree 2) -> N = 256 batched nodes.
    nodes_per_graph = 16
    n_graphs = 16
    N = nodes_per_graph * n_graphs
    nfeat, nhid, nout = 16, 32, 32
    graph_sizes = [nodes_per_graph] * n_graphs

    # Block-diagonal batched adjacency, symmetric-normalized (DGL norm='both').
    A = np.zeros((N, N), dtype=np.float32)
    for g in range(n_graphs):
        s = g * nodes_per_graph
        for i in range(nodes_per_graph):
            a_i = s + i
            a_j = s + (i + 1) % nodes_per_graph
            A[a_i, a_j] = 1.0
            A[a_j, a_i] = 1.0
    deg = A.sum(axis=1)
    d_inv_sqrt = 1.0 / np.sqrt(deg)
    ahat = jnp.asarray(d_inv_sqrt[:, None] * A * d_inv_sqrt[None, :],
                       dtype=jnp.float32)

    # Per-graph mean readout matrix (G, N) for dgl.mean_nodes.
    mean_np = np.zeros((n_graphs, N), dtype=np.float32)
    for g in range(n_graphs):
        s = g * nodes_per_graph
        mean_np[g, s:s + nodes_per_graph] = 1.0 / nodes_per_graph
    mean_mat = jnp.asarray(mean_np)

    # Deterministic inputs / parameters.
    key = jax.random.PRNGKey(0)
    k_x, k_w1, k_w2, k_b1, k_b2 = jax.random.split(key, 5)
    x = jax.random.normal(k_x, (N, nfeat), dtype=jnp.float32)
    w1 = jax.random.normal(k_w1, (nfeat, nhid), dtype=jnp.float32) / np.sqrt(nfeat)
    b1 = 0.1 * jax.random.normal(k_b1, (nhid,), dtype=jnp.float32)
    w2 = (jax.random.normal(k_w2, (nhid + nfeat, nout), dtype=jnp.float32)
          / np.sqrt(nhid + nfeat))
    b2 = 0.1 * jax.random.normal(k_b2, (nout,), dtype=jnp.float32)

    # Run with 2 row tiles (tm=128) so the banded, prefetch-indexed Ahat path
    # and the per-tile pooled partials are exercised.
    hg = from_to_gcn_forward(ahat, x, w1, b1, w2, b2, mean_mat, graph_sizes,
                             row_tile=128)
    jax.block_until_ready(hg)
    assert hg.shape == (n_graphs, nhid + nout)

    ref_matched = _reference_matched(ahat, x, w1, b1, w2, b2, mean_mat)
    np.testing.assert_allclose(np.asarray(hg), np.asarray(ref_matched),
                               rtol=1e-2, atol=1e-2)
    ref_f32 = _reference_f32(ahat, x, w1, b1, w2, b2, mean_mat)
    np.testing.assert_allclose(np.asarray(hg), np.asarray(ref_f32),
                               rtol=5e-2, atol=5e-2)

    # Also exercise the automatic (VMEM-budget-driven) tile selection path.
    hg_auto = from_to_gcn_forward(ahat, x, w1, b1, w2, b2, mean_mat, graph_sizes)
    jax.block_until_ready(hg_auto)
    np.testing.assert_allclose(np.asarray(hg_auto), np.asarray(ref_matched),
                               rtol=1e-2, atol=1e-2)

    print("KERNEL_OK")
</pallas_src>

<mosaic_0001>
module attributes {stable_mosaic.version = 11 : i64} {
  func.func @_layer2_kernel(%arg0: i32, %arg1: memref<2xi32, #tpu.memory_space<smem>>, %arg2: memref<128x128xbf16, #tpu.memory_space<vmem>>, %arg3: memref<128x32xbf16, #tpu.memory_space<vmem>>, %arg4: memref<1x32xf32, #tpu.memory_space<vmem>>, %arg5: memref<16x128xf32, #tpu.memory_space<vmem>>, %arg6: memref<1x16x32xf32, #tpu.memory_space<vmem>>) attributes {dimension_semantics = [#tpu.dimension_semantics<parallel>], iteration_bounds = array<i64: 2>, scalar_prefetch = 1 : i64, scratch_operands = 0 : i64, tpu.core_type = #tpu.core_type<tc>, window_params = [{transform_indices = @transform_0, window_bounds = array<i64: 128, 128>}, {transform_indices = @transform_1, window_bounds = array<i64: 128, 32>}, {pipeline_mode = #tpu.pipeline_mode<synchronous>, transform_indices = @transform_2, window_bounds = array<i64: 1, 32>}, {transform_indices = @transform_3, window_bounds = array<i64: 16, 128>}, {transform_indices = @transform_4, window_bounds = array<i64: 1, 16, 32>}]} {
    %c0 = arith.constant 0 : index
    %c0_0 = arith.constant 0 : index
    %0 = vector.load %arg2[%c0, %c0_0] : memref<128x128xbf16, #tpu.memory_space<vmem>>, vector<128x128xbf16>
    %c0_1 = arith.constant 0 : index
    %c0_2 = arith.constant 0 : index
    %1 = vector.load %arg3[%c0_1, %c0_2] : memref<128x32xbf16, #tpu.memory_space<vmem>>, vector<128x32xbf16>
    %cst = arith.constant dense<0.000000e+00> : vector<128x32xf32>
    %2 = tpu.matmul %0, %1, %cst {dimension_numbers = #tpu.dot_dimension_numbers<[1], [0], [0], [1], [0, 0, 1, 1], [], []>} : vector<128x128xbf16>, vector<128x32xbf16>, vector<128x32xf32> -> vector<128x32xf32>
    %c0_3 = arith.constant 0 : index
    %c0_4 = arith.constant 0 : index
    %3 = vector.load %arg4[%c0_3, %c0_4] : memref<1x32xf32, #tpu.memory_space<vmem>>, vector<1x32xf32>
    %4 = vector.broadcast %3 : vector<1x32xf32> to vector<128x32xf32>
    %5 = arith.addf %2, %4 : vector<128x32xf32>
    %cst_5 = arith.constant 0.000000e+00 : f32
    %6 = vector.broadcast %cst_5 : f32 to vector<128x32xf32>
    %7 = arith.maximumf %5, %6 : vector<128x32xf32>
    %c0_6 = arith.constant 0 : index
    %c0_7 = arith.constant 0 : index
    %8 = vector.load %arg5[%c0_6, %c0_7] : memref<16x128xf32, #tpu.memory_space<vmem>>, vector<16x128xf32>
    %cst_8 = arith.constant dense<0.000000e+00> : vector<16x32xf32>
    %9 = tpu.matmul %8, %7, %cst_8 {dimension_numbers = #tpu.dot_dimension_numbers<[1], [0], [0], [1], [0, 0, 1, 1], [], []>} : vector<16x128xf32>, vector<128x32xf32>, vector<16x32xf32> -> vector<16x32xf32>
    %10 = vector.shape_cast %9 : vector<16x32xf32> to vector<1x16x32xf32>
    %c0_9 = arith.constant 0 : index
    %c0_10 = arith.constant 0 : index
    %c0_11 = arith.constant 0 : index
    %11 = vector.load %arg6[%c0_9, %c0_10, %c0_11] : memref<1x16x32xf32, #tpu.memory_space<vmem>>, vector<1x16x32xf32>
    tpu.vector_store %arg6[%c0_9, %c0_10, %c0_11], %10 {strides = array<i32>} : memref<1x16x32xf32, #tpu.memory_space<vmem>>, vector<1x16x32xf32>,
    return
  }
  func.func @transform_0(%arg0: i32, %arg1: memref<2xi32, #tpu.memory_space<smem>>) -> (i32, i32) {
    %0 = arith.index_cast %arg0 : i32 to index
    %1 = memref.load %arg1[%0] : memref<2xi32, #tpu.memory_space<smem>>
    %c0_i32 = arith.constant 0 : i32
    return %arg0, %1 : i32, i32
  }
  func.func @transform_1(%arg0: i32, %arg1: memref<2xi32, #tpu.memory_space<smem>>) -> (i32, i32) {
    %0 = arith.index_cast %arg0 : i32 to index
    %1 = memref.load %arg1[%0] : memref<2xi32, #tpu.memory_space<smem>>
    %c0_i32 = arith.constant 0 : i32
    %c0_i32_0 = arith.constant 0 : i32
    return %1, %c0_i32 : i32, i32
  }
  func.func @transform_2(%arg0: i32, %arg1: memref<2xi32, #tpu.memory_space<smem>>) -> (i32, i32) {
    %c0_i32 = arith.constant 0 : i32
    %c0_i32_0 = arith.constant 0 : i32
    %c0_i32_1 = arith.constant 0 : i32
    return %c0_i32, %c0_i32_0 : i32, i32
  }
  func.func @transform_3(%arg0: i32, %arg1: memref<2xi32, #tpu.memory_space<smem>>) -> (i32, i32) {
    %c0_i32 = arith.constant 0 : i32
    %c0_i32_0 = arith.constant 0 : i32
    return %c0_i32, %arg0 : i32, i32
  }
  func.func @transform_4(%arg0: i32, %arg1: memref<2xi32, #tpu.memory_space<smem>>) -> (i32, i32, i32) {
    %c0_i32 = arith.constant 0 : i32
    %c0_i32_0 = arith.constant 0 : i32
    %c0_i32_1 = arith.constant 0 : i32
    return %arg0, %c0_i32, %c0_i32_0 : i32, i32, i32
  }
}

module attributes {stable_mosaic.version = 11 : i64} {
  func.func @_layer1_kernel(%arg0: i32, %arg1: memref<2xi32, #tpu.memory_space<smem>>, %arg2: memref<128x128xbf16, #tpu.memory_space<vmem>>, %arg3: memref<128x32xbf16, #tpu.memory_space<vmem>>, %arg4: memref<128x32xf32, #tpu.memory_space<vmem>>, %arg5: memref<1x32xf32, #tpu.memory_space<vmem>>, %arg6: memref<32x32xf32, #tpu.memory_space<vmem>>, %arg7: memref<16x128xf32, #tpu.memory_space<vmem>>, %arg8: memref<128x32xbf16, #tpu.memory_space<vmem>>, %arg9: memref<1x16x32xf32, #tpu.memory_space<vmem>>) attributes {dimension_semantics = [#tpu.dimension_semantics<parallel>], iteration_bounds = array<i64: 2>, scalar_prefetch = 1 : i64, scratch_operands = 0 : i64, tpu.core_type = #tpu.core_type<tc>, window_params = [{transform_indices = @transform_0, window_bounds = array<i64: 128, 128>}, {transform_indices = @transform_1, window_bounds = array<i64: 128, 32>}, {transform_indices = @transform_2, window_bounds = array<i64: 128, 32>}, {pipeline_mode = #tpu.pipeline_mode<synchronous>, transform_indices = @transform_3, window_bounds = array<i64: 1, 32>}, {pipeline_mode = #tpu.pipeline_mode<synchronous>, transform_indices = @transform_4, window_bounds = array<i64: 32, 32>}, {transform_indices = @transform_5, window_bounds = array<i64: 16, 128>}, {transform_indices = @transform_6, window_bounds = array<i64: 128, 32>}, {transform_indices = @transform_7, window_bounds = array<i64: 1, 16, 32>}]} {
    %c0 = arith.constant 0 : index
    %c0_0 = arith.constant 0 : index
    %0 = vector.load %arg2[%c0, %c0_0] : memref<128x128xbf16, #tpu.memory_space<vmem>>, vector<128x128xbf16>
    %c0_1 = arith.constant 0 : index
    %c0_2 = arith.constant 0 : index
    %1 = vector.load %arg3[%c0_1, %c0_2] : memref<128x32xbf16, #tpu.memory_space<vmem>>, vector<128x32xbf16>
    %cst = arith.constant dense<0.000000e+00> : vector<128x32xf32>
    %2 = tpu.matmul %0, %1, %cst {dimension_numbers = #tpu.dot_dimension_numbers<[1], [0], [0], [1], [0, 0, 1, 1], [], []>} : vector<128x128xbf16>, vector<128x32xbf16>, vector<128x32xf32> -> vector<128x32xf32>
    %c0_3 = arith.constant 0 : index
    %c0_4 = arith.constant 0 : index
    %3 = vector.load %arg5[%c0_3, %c0_4] : memref<1x32xf32, #tpu.memory_space<vmem>>, vector<1x32xf32>
    %4 = vector.broadcast %3 : vector<1x32xf32> to vector<128x32xf32>
    %5 = arith.addf %2, %4 : vector<128x32xf32>
    %cst_5 = arith.constant 0.000000e+00 : f32
    %6 = vector.broadcast %cst_5 : f32 to vector<128x32xf32>
    %7 = arith.maximumf %5, %6 : vector<128x32xf32>
    %c0_6 = arith.constant 0 : index
    %c0_7 = arith.constant 0 : index
    %8 = vector.load %arg6[%c0_6, %c0_7] : memref<32x32xf32, #tpu.memory_space<vmem>>, vector<32x32xf32>
    %cst_8 = arith.constant dense<0.000000e+00> : vector<128x32xf32>
    %9 = tpu.matmul %7, %8, %cst_8 {dimension_numbers = #tpu.dot_dimension_numbers<[1], [0], [0], [1], [0, 0, 1, 1], [], []>} : vector<128x32xf32>, vector<32x32xf32>, vector<128x32xf32> -> vector<128x32xf32>
    %c0_9 = arith.constant 0 : index
    %c0_10 = arith.constant 0 : index
    %10 = vector.load %arg4[%c0_9, %c0_10] : memref<128x32xf32, #tpu.memory_space<vmem>>, vector<128x32xf32>
    %11 = arith.addf %9, %10 : vector<128x32xf32>
    %12 = arith.truncf %11 : vector<128x32xf32> to vector<128x32xbf16>
    %c0_11 = arith.constant 0 : index
    %c0_12 = arith.constant 0 : index
    %13 = vector.load %arg8[%c0_11, %c0_12] : memref<128x32xbf16, #tpu.memory_space<vmem>>, vector<128x32xbf16>
    tpu.vector_store %arg8[%c0_11, %c0_12], %12 {strides = array<i32>} : memref<128x32xbf16, #tpu.memory_space<vmem>>, vector<128x32xbf16>,
    %c0_13 = arith.constant 0 : index
    %c0_14 = arith.constant 0 : index
    %14 = vector.load %arg7[%c0_13, %c0_14] : memref<16x128xf32, #tpu.memory_space<vmem>>, vector<16x128xf32>
    %cst_15 = arith.constant dense<0.000000e+00> : vector<16x32xf32>
    %15 = tpu.matmul %14, %7, %cst_15 {dimension_numbers = #tpu.dot_dimension_numbers<[1], [0], [0], [1], [0, 0, 1, 1], [], []>} : vector<16x128xf32>, vector<128x32xf32>, vector<16x32xf32> -> vector<16x32xf32>
    %16 = vector.shape_cast %15 : vector<16x32xf32> to vector<1x16x32xf32>
    %c0_16 = arith.constant 0 : index
    %c0_17 = arith.constant 0 : index
    %c0_18 = arith.constant 0 : index
    %17 = vector.load %arg9[%c0_16, %c0_17, %c0_18] : memref<1x16x32xf32, #tpu.memory_space<vmem>>, vector<1x16x32xf32>
    tpu.vector_store %arg9[%c0_16, %c0_17, %c0_18], %16 {strides = array<i32>} : memref<1x16x32xf32, #tpu.memory_space<vmem>>, vector<1x16x32xf32>,
    return
  }
  func.func @transform_0(%arg0: i32, %arg1: memref<2xi32, #tpu.memory_space<smem>>) -> (i32, i32) {
    %0 = arith.index_cast %arg0 : i32 to index
    %1 = memref.load %arg1[%0] : memref<2xi32, #tpu.memory_space<smem>>
    %c0_i32 = arith.constant 0 : i32
    return %arg0, %1 : i32, i32
  }
  func.func @transform_1(%arg0: i32, %arg1: memref<2xi32, #tpu.memory_space<smem>>) -> (i32, i32) {
    %0 = arith.index_cast %arg0 : i32 to index
    %1 = memref.load %arg1[%0] : memref<2xi32, #tpu.memory_space<smem>>
    %c0_i32 = arith.constant 0 : i32
    %c0_i32_0 = arith.constant 0 : i32
    return %1, %c0_i32 : i32, i32
  }
  func.func @transform_2(%arg0: i32, %arg1: memref<2xi32, #tpu.memory_space<smem>>) -> (i32, i32) {
    %c0_i32 = arith.constant 0 : i32
    %c0_i32_0 = arith.constant 0 : i32
    return %arg0, %c0_i32 : i32, i32
  }
  func.func @transform_3(%arg0: i32, %arg1: memref<2xi32, #tpu.memory_space<smem>>) -> (i32, i32) {
    %c0_i32 = arith.constant 0 : i32
    %c0_i32_0 = arith.constant 0 : i32
    %c0_i32_1 = arith.constant 0 : i32
    return %c0_i32, %c0_i32_0 : i32, i32
  }
  func.func @transform_4(%arg0: i32, %arg1: memref<2xi32, #tpu.memory_space<smem>>) -> (i32, i32) {
    %c0_i32 = arith.constant 0 : i32
    %c0_i32_0 = arith.constant 0 : i32
    %c0_i32_1 = arith.constant 0 : i32
    return %c0_i32, %c0_i32_0 : i32, i32
  }
  func.func @transform_5(%arg0: i32, %arg1: memref<2xi32, #tpu.memory_space<smem>>) -> (i32, i32) {
    %c0_i32 = arith.constant 0 : i32
    %c0_i32_0 = arith.constant 0 : i32
    return %c0_i32, %arg0 : i32, i32
  }
  func.func @transform_6(%arg0: i32, %arg1: memref<2xi32, #tpu.memory_space<smem>>) -> (i32, i32) {
    %c0_i32 = arith.constant 0 : i32
    %c0_i32_0 = arith.constant 0 : i32
    return %arg0, %c0_i32 : i32, i32
  }
  func.func @transform_7(%arg0: i32, %arg1: memref<2xi32, #tpu.memory_space<smem>>) -> (i32, i32, i32) {
    %c0_i32 = arith.constant 0 : i32
    %c0_i32_0 = arith.constant 0 : i32
    %c0_i32_1 = arith.constant 0 : i32
    return %arg0, %c0_i32, %c0_i32_0 : i32, i32, i32
  }
}

</mosaic_0001>

<bundles_post_ra>
// kernel: _from_to_gcn_jit.3
= control target key start
LH: loop header
LB: loop body
LE: loop exit
PB: predicated region body
PF: predicated region fallthrough
CT: control target
= control target key end

     0   :  { %s1251_s0 = inlined_call_operand.vmem [shape: s32[2], index: 0, kind: input, shape index: {}]   ;;  %s1252_s1 = inlined_call_operand.vmem [shape: bf16[256,256], index: 1, kind: input, shape index: {}]   ;;  %s1253_s2 = inlined_call_operand.vmem [shape: bf16[256,32], index: 2, kind: input, shape index: {}]   ;;  %s1254_s3 = inlined_call_operand.vmem [shape: f32[1,32], index: 3, kind: input, shape index: {}]   ;;  %s1255_s4 = inlined_call_operand.vmem [shape: f32[16,256], index: 4, kind: input, shape index: {}]   ;;  %s1256_s5 = inlined_call_operand.vmem [shape: f32[2,16,32], index: 5, kind: output, shape index: {}]  }
   0x1   :  { %s10_s20 = sshll.u32 %s1251_s0, 4  ;;  %s11_s20 = int_to_ptr.vmem [resolvable:$true] %s10_s20 }
   0x2   :  { %s1024_s21 = scalar_lea.vmem %s11_s20, 16  ;;  %p1029_p1 = scmp.lt.s32.totalorder %s11_s20, %s11_s20 }
   0x3   :  { %p1025_p0 = scmp.ne.s32.totalorder %s11_s20, %s1024_s21  ;;  %p1030_p2 = scmp.lt.s32.totalorder %s1024_s21, %s1024_s21 }
   0x5   :  { %p1031_p3 = por %p1030_p2, %p1029_p1 }
   0x7   :  { %p1032_p4 = pnand %p1031_p3, %p1025_p0 }
   0x9   :  { %1035 = shalt.err (!%p1032_p4)  }
   0xa   :  { %s1078_s22 = smov [#allocation3]  }
   0xb   :  { %13 = dma.vmem_to_smem %s11_s20, 16, %s1078_s22, [#allocation2] }
   0xc   :  { %1056 = dma.done.wait [#allocation2], 16 }
   0xd   :  { %1057 = vsyncadd [#allocation2], 4294967280 }
   0xe   :  { %15 = sfence }
   0xf   :  { %s1112_s23 = smov 0   ;;  %s1114_s24 = smov 0  }
  0x10   :  { %s1116_s25 = smov 0   ;;  %s1118_s0 = smov 0  }
  0x11   :  { %s1120_s26 = smov 0  }
  0x12 LB: > { %s1138_s27 = sadd.s32 4294967295, %s1076_s26   ;;  %s1141_s28 = sadd.s32 1, %s1076_s26   ;;  %s1076_s26 = sphi %s1120_s26, %s1262_s26   ;;  %s1072_s0 = sphi %s1118_s0, %s1261_s0   ;;  %s1068_s25 = sphi %s1116_s25, %s1260_s25   ;;  %s1064_s24 = sphi %s1114_s24, %s1259_s24   ;;  %s1060_s23 = sphi %s1112_s23, %s1258_s23  }
  0x13   : > { %s25_s29 = sld [smem:[#allocation3 + %s1076_s26]]  ;;  %s27_s30 = ssub.s32 %s1076_s26, %s1141_s28 }
  0x14   : > { %s26_s6 = sld [smem:[#allocation3 + %s1141_s28]]  ;;  %p39_p5 = scmp.ne.s32.totalorder %s1072_s0, %s1068_s25 }
  0x15   : > { %p40_p6 = scmp.eq.s32.totalorder %s1076_s26, 0  ;;  %p105_p7 = scmp.eq.s32.totalorder %s27_s30, 0 }
  0x16   : > { %s107_s7 = sadd.s32 1, %s1064_s24  ;;  %p114_p9 = scmp.ne.s32.totalorder %s1064_s24, %s1060_s23 }
  0x17   : > { %p41_p8 = por %p40_p6, %p39_p5  ;;  %s32_s12 = sadd.s32 1, %s1072_s0 }
  0x18   : > { %s1154_s8 = scalar_select %p105_p7, %s1064_s24, %s107_s7  }
  0x19   : > { %p1156_p10 = por %p114_p9, %p40_p6  ;;  %p831_p12 = scmp.ge.s32.totalorder %s1076_s26, 2 }
  0x1a   : > { %s28_s10 = ssub.s32 %s25_s29, %s26_s6 }
  0x1b   : > { %s29_s11 = sor.u32 %s28_s10, %s27_s30  ;;  %169 = sbr.rel (%p831_p12) target bundleno = 57 (0x39), region = 20 }
  0x1c   : > { %p30_p11 = scmp.eq.s32.totalorder %s29_s11, 0 }
  0x1e   : > { %s1162_s13 = scalar_select %p30_p11, %s1072_s0, %s32_s12  }
  0x20   : > { %172 = sbr.rel (!%p41_p8) target bundleno = 52 (0x34), region = 24  ;;  %s177_s14 = sld [smem:[#allocation3 + %s1076_s26]] (%p41_p8) }
  0x21   : > { %s174_s15 = sand.u32 (%p41_p8), 1, %s1072_s0   ;;  %s864_s16 = sshll.u32 (%p41_p8), %s1076_s26, 5 }
  0x22   : > { %s832_s17 = sshll.u32 (%p41_p8), %s174_s15, 6 }
  0x23   : > { %s176_s29 = scalar_lea.vmem (%p41_p8), [#allocation4], %s832_s17 }
  0x26   : > { %s180_s18 = sadd.s32 %s864_s16, %s177_s14 }
  0x27   : > { %s835_s19 = sshll.u32 %s180_s18, 2 }
  0x28   : > { %s1171_s22 = scalar_lea.vmem %s1252_s1, %s835_s19 }
  0x29   : > { %v199_v0 = vld [vmem:[%s1171_s22] sm:$0xf]  ;;  %v201_v1 = vld [vmem:[%s1171_s22 + $0x8] sm:$0xf]  ;;  %v203_v2 = vld [vmem:[%s1171_s22 + $0x10] sm:$0xf] }
  0x2a   : > { %200 = vst [vmem:[%s176_s29] sm:$0xf] %v199_v0  ;;  %202 = vst [vmem:[%s176_s29 + $0x4] sm:$0xf] %v201_v1  ;;  %v205_v3 = vld [vmem:[%s1171_s22 + $0x18] sm:$0xf] }
  0x2b   : > { %204 = vst [vmem:[%s176_s29 + $0x8] sm:$0xf] %v203_v2  ;;  %v207_v4 = vld [vmem:[%s1171_s22 + $0x20] sm:$0xf]  ;;  %v209_v5 = vld [vmem:[%s1171_s22 + $0x28] sm:$0xf] }
  0x2c   : > { %206 = vst [vmem:[%s176_s29 + $0xc] sm:$0xf] %v205_v3  ;;  %208 = vst [vmem:[%s176_s29 + $0x10] sm:$0xf] %v207_v4  ;;  %v211_v6 = vld [vmem:[%s1171_s22 + $0x30] sm:$0xf] }
  0x2d   : > { %210 = vst [vmem:[%s176_s29 + $0x14] sm:$0xf] %v209_v5  ;;  %v213_v7 = vld [vmem:[%s1171_s22 + $0x38] sm:$0xf]  ;;  %v215_v8 = vld [vmem:[%s1171_s22 + $0x40] sm:$0xf] }
  0x2e   : > { %212 = vst [vmem:[%s176_s29 + $0x18] sm:$0xf] %v211_v6  ;;  %214 = vst [vmem:[%s176_s29 + $0x1c] sm:$0xf] %v213_v7  ;;  %v217_v9 = vld [vmem:[%s1171_s22 + $0x48] sm:$0xf] }
  0x2f   : > { %216 = vst [vmem:[%s176_s29 + $0x20] sm:$0xf] %v215_v8  ;;  %v219_v10 = vld [vmem:[%s1171_s22 + $0x50] sm:$0xf]  ;;  %v221_v11 = vld [vmem:[%s1171_s22 + $0x58] sm:$0xf] }
  0x30   : > { %218 = vst [vmem:[%s176_s29 + $0x24] sm:$0xf] %v217_v9  ;;  %220 = vst [vmem:[%s176_s29 + $0x28] sm:$0xf] %v219_v10  ;;  %v223_v12 = vld [vmem:[%s1171_s22 + $0x60] sm:$0xf] }
  0x31   : > { %222 = vst [vmem:[%s176_s29 + $0x2c] sm:$0xf] %v221_v11  ;;  %v225_v13 = vld [vmem:[%s1171_s22 + $0x68] sm:$0xf]  ;;  %v227_v14 = vld [vmem:[%s1171_s22 + $0x70] sm:$0xf] }
  0x32   : > { %224 = vst [vmem:[%s176_s29 + $0x30] sm:$0xf] %v223_v12  ;;  %226 = vst [vmem:[%s176_s29 + $0x34] sm:$0xf] %v225_v13  ;;  %v229_v15 = vld [vmem:[%s1171_s22 + $0x78] sm:$0xf] }
  0x33   : > { %228 = vst [vmem:[%s176_s29 + $0x38] sm:$0xf] %v227_v14  ;;  %230 = vst [vmem:[%s176_s29 + $0x3c] sm:$0xf] %v229_v15 }
  0x34 PF: > { %297 = sbr.rel (!%p1156_p10) target bundleno = 57 (0x39), region = 69  ;;  %s299_s30 = sand.u32 (%p1156_p10), 1, %s1064_s24  }
  0x35   : > { %s837_s6 = sshll.u32 (%p1156_p10), %s1076_s26, 3  ;;  %s836_s7 = sshll.u32 (%p1156_p10), %s299_s30, 4 }
  0x36   : > { %s303_s12 = scalar_lea.vmem (%p1156_p10), %s1255_s4, %s837_s6  ;;  %s301_s14 = scalar_lea.vmem (%p1156_p10), [#allocation5], %s836_s7 }
  0x37   : > { %v334_v16 = vld [vmem:[%s303_s12] sm:$0xff] (%p1156_p10)  ;;  %v336_v17 = vld [vmem:[%s303_s12 + $0x10] sm:$0xff] (%p1156_p10) }
  0x38   : > { %335 = vst [vmem:[%s301_s14] sm:$0xff] (%p1156_p10), %v334_v16  ;;  %337 = vst [vmem:[%s301_s14 + $0x8] sm:$0xff] (%p1156_p10), %v336_v17 }
  0x39 PF: > { %p838_p13 = scmp.ge.s32.totalorder %s1076_s26, 1  ;;  %p342_p0 = scmp.lt.s32.totalorder %s1076_s26, 3 }
  0x3b   : > { %p343_p1 = pnand %p838_p13, %p342_p0 }
  0x3c   : > { %s393_s9 = sld [smem:[#allocation3 + %s1138_s27]] (!%p343_p1)  ;;  %s349_s15 = sand.u32 (!%p343_p1), 1, %s1068_s25  }
  0x3d   : > { %346 = sbr.rel (%p343_p1) target bundleno = 558 (0x22e), region = 107  ;;  %s839_s16 = sshll.u32 (!%p343_p1), %s349_s15, 6 }
  0x3e   : > { %s1200_s17 = scalar_lea.vmem (!%p343_p1), [#allocation4], %s839_s16  ;;  %s356_s25 = sand.u32 (!%p343_p1), 1, %s1060_s23  }
  0x3f   : > { %s1214_s22 = sshll.u32 (!%p343_p1), %s356_s25, 4  ;;  %p401_p3 = scmp.lt.s32.totalorder (!%p343_p1), %s1138_s27, 1 }
  0x40   : > { %s358_s29 = scalar_lea.vmem (!%p343_p1), [#allocation5], %s1214_s22 }
  0x42   : > { %v1016_v18 = vld [vmem:[%s1200_s17] sm:$0xff]   ;;  %s841_s18 = sshll.u32 %s393_s9, 4  ;;  %v1017_v27 = vld [vmem:[%s1200_s17 + $0x8] sm:$0xff]   ;;  %v1018_v28 = vld [vmem:[%s1200_s17 + $0x10] sm:$0xff]   ;;  %s1266_s27 = smov (!%p401_p3, %s1138_s27), 1  ;;  %vm732_vm0 = vcmask 261120  }
  0x43   : > { %916 = vmatprep.mubr.bf16.mxu0 %v1016_v18  ;;  %p395_p2 = scmp.lt.s32.totalorder %s841_s18, 31  ;;  %v1019_v29 = vld [vmem:[%s1200_s17 + $0x18] sm:$0xff]   ;;  %v1020_v30 = vld [vmem:[%s1200_s17 + $0x20] sm:$0xff]   ;;  %v1021_v31 = vld [vmem:[%s1200_s17 + $0x28] sm:$0xff]   ;;  %s865_s6 = sshll.u32 %s1266_s27, 4 }
  0x44   : > { %v1022_v32 = vld [vmem:[%s1200_s17 + $0x30] sm:$0xff]   ;;  %v1023_v33 = vld [vmem:[%s1200_s17 + $0x38] sm:$0xff]   ;;  %v845_v49 = vld [vmem:[%s1254_s3] ss:$0 sm:$0xff]  ;;  %s405_s11 = scalar_lea.vmem %s1256_s5, %s865_s6 }
  0x45   : > { %s1264_s18 = smov (!%p395_p2, %s841_s18), 31  ;;  %v655_v34 = vld [vmem:[%s358_s29] sm:$0xff] }
  0x46   : > { %s842_s19 = sshll.u32 %s1264_s18, 2  ;;  %964 = vmatprep.mubr.f32.mxu1 %v655_v34 }
  0x47   : > { %s398_s26 = scalar_lea.vmem %s1253_s2, %s842_s19 }
  0x48   : > { %v1008_v19 = vld [vmem:[%s398_s26 + $0x38] sm:$0xff]   ;;  %v1009_v20 = vld [vmem:[%s398_s26 + $0x30] sm:$0xff]   ;;  %v1010_v21 = vld [vmem:[%s398_s26 + $0x28] sm:$0xff]  }
  0x49   : > { %900 = vmatprep.subr.bf16.mxu0 %v1008_v19  ;;  %v1011_v22 = vld [vmem:[%s398_s26 + $0x20] sm:$0xff]   ;;  %v1012_v23 = vld [vmem:[%s398_s26 + $0x18] sm:$0xff]   ;;  %v1013_v24 = vld [vmem:[%s398_s26 + $0x10] sm:$0xff]  }
  0x4a   : > { %901 = vmatpush3.bf16.msra.mxu0 %v1008_v19  ;;  %v1014_v25 = vld [vmem:[%s398_s26 + $0x8] sm:$0xff]   ;;  %v1015_v26 = vld [vmem:[%s398_s26] sm:$0xff]  }
  0x4b   : > { %902 = vmatprep.subr.bf16.mxu0 %v1009_v20 }
  0x4e   : > { %903 = vmatpush3.bf16.msra.mxu0 %v1009_v20  ;;  %v656_v20 = vld [vmem:[%s358_s29 + $0x8] sm:$0xff] }
  0x4f   : > { %904 = vmatprep.subr.bf16.mxu0 %v1010_v21 }
  0x52   : > { %905 = vmatpush3.bf16.msra.mxu0 %v1010_v21 }
  0x53   : > { %906 = vmatprep.subr.bf16.mxu0 %v1011_v22 }
  0x56   : > { %907 = vmatpush3.bf16.msra.mxu0 %v1011_v22 }
  0x57   : > { %908 = vmatprep.subr.bf16.mxu0 %v1012_v23 }
  0x5a   : > { %909 = vmatpush3.bf16.msra.mxu0 %v1012_v23 }
  0x5b   : > { %910 = vmatprep.subr.bf16.mxu0 %v1013_v24 }
  0x5e   : > { %911 = vmatpush3.bf16.msra.mxu0 %v1013_v24 }
  0x5f   : > { %912 = vmatprep.subr.bf16.mxu0 %v1014_v25 }
  0x62   : > { %913 = vmatpush3.bf16.msra.mxu0 %v1014_v25 }
  0x63   : > { %914 = vmatprep.subr.bf16.mxu0 %v1015_v26 }
  0x66   : > { %915 = vmatpush3.bf16.msra.mxu0 %v1015_v26 }
  0x69   : > { %917 = vmatmul.mubr.bf16.vlgmr.msra.gmra.mxu0 %v1017_v27 }
  0x6a   : > { %920 = vmatprep.mubr.bf16.mxu0 %v1018_v28 }
  0x71   : > { %921 = vmatmul.mubr.bf16.gmra.mxu0 %v1019_v29 }
  0x72   : > { %924 = vmatprep.mubr.bf16.mxu0 %v1020_v30 }
  0x79   : > { %925 = vmatmul.mubr.bf16.gmra.mxu0 %v1021_v31 }
  0x7a   : > { %928 = vmatprep.mubr.bf16.mxu0 %v1022_v32 }
  0x81   : > { %929 = vmatmul.mubr.bf16.gmra.mxu0 %v1023_v33 }
 0x129   : > { %v918_v35 = vpop.f32.mrf.mxu0 }
 0x12a   : > { %v585_v12 = vadd.f32 %v918_v35, %v845_v49 }
 0x12b   : > { %v1219_v36 = vpop.f32.mrf.mxu0 }
 0x12c   : > { %v641_v16 = vmax.f32 %v585_v12, 0.0  ;;  %v577_v17 = vadd.f32 %v845_v49, %v1219_v36 }
 0x12d   : > { %v919_v37 = vpop.f32.mrf.mxu0 }
 0x12e   : > { %v588_v10 = vadd.f32 %v919_v37, %v845_v49  ;;  %v639_v19 = vmax.f32 %v577_v17, 0.0 }
 0x12f   : > { %v1221_v38 = vpop.f32.mrf.mxu0 }
 0x130   : > { %v642_v14 = vmax.f32 %v588_v10, 0.0  ;;  %v580_v15 = vadd.f32 %v845_v49, %v1221_v38 }
 0x131   : > { %v922_v39 = vpop.f32.mrf.mxu0 }
 0x132   : > { %v601_v4 = vadd.f32 %v922_v39, %v845_v49  ;;  %v640_v18 = vmax.f32 %v580_v15, 0.0 }
 0x133   : > { %v592_v40 = vpop.f32.mrf.mxu0 }
 0x134   : > { %v645_v8 = vmax.f32 %v601_v4, 0.0  ;;  %v593_v9 = vadd.f32 %v845_v49, %v592_v40 }
 0x135   : > { %v923_v41 = vpop.f32.mrf.mxu0 }
 0x136   : > { %v604_v2 = vadd.f32 %v923_v41, %v845_v49  ;;  %v643_v13 = vmax.f32 %v593_v9, 0.0 }
 0x137   : > { %v595_v42 = vpop.f32.mrf.mxu0 }
 0x138   : > { %v646_v6 = vmax.f32 %v604_v2, 0.0  ;;  %v596_v7 = vadd.f32 %v845_v49, %v595_v42 }
 0x139   : > { %v926_v43 = vpop.f32.mrf.mxu0 }
 0x13a   : > { %v617_v60 = vadd.f32 %v926_v43, %v845_v49  ;;  %v644_v11 = vmax.f32 %v596_v7, 0.0 }
 0x13b   : > { %v608_v44 = vpop.f32.mrf.mxu0 }
 0x13c   : > { %v649_v0 = vmax.f32 %v617_v60, 0.0  ;;  %v609_v1 = vadd.f32 %v845_v49, %v608_v44 }
 0x13d   : > { %v927_v45 = vpop.f32.mrf.mxu0 }
 0x13e   : > { %v620_v58 = vadd.f32 %v927_v45, %v845_v49  ;;  %v647_v5 = vmax.f32 %v609_v1, 0.0 }
 0x13f   : > { %v611_v46 = vpop.f32.mrf.mxu0 }
 0x140   : > { %v650_v62 = vmax.f32 %v620_v58, 0.0  ;;  %v612_v63 = vadd.f32 %v845_v49, %v611_v46 }
 0x141   : > { %v930_v47 = vpop.f32.mrf.mxu0 }
 0x142   : > { %v633_v51 = vadd.f32 %v930_v47, %v845_v49  ;;  %v648_v3 = vmax.f32 %v612_v63, 0.0 }
 0x143   : > { %v624_v48 = vpop.f32.mrf.mxu0 }
 0x144   : > { %v653_v56 = vmax.f32 %v633_v51, 0.0  ;;  %v625_v57 = vadd.f32 %v845_v49, %v624_v48 }
 0x145   : > { %v931_v50 = vpop.f32.mrf.mxu0 }
 0x146   : > { %v636_v52 = vadd.f32 %v931_v50, %v845_v49  ;;  %v651_v61 = vmax.f32 %v625_v57, 0.0 }
 0x147   : > { %v627_v53 = vpop.f32.mrf.mxu0 }
 0x148   : > { %v654_v54 = vmax.f32 %v636_v52, 0.0  ;;  %v628_v55 = vadd.f32 %v845_v49, %v627_v53 }
 0x14a   : > { %932 = vmatprep.subr.mxu1 %v654_v54  ;;  %v652_v59 = vmax.f32 %v628_v55, 0.0 }
 0x14b   : > { %933 = vmatpush3.msra.mxu1 %v654_v54 }
 0x14c   : > { %934 = vmatprep.subr.mxu1 %v653_v56 }
 0x14d   : > { %935 = vmatpush3.msra.mxu1 %v653_v56 }
 0x14e   : > { %936 = vmatprep.subr.mxu1 %v652_v59 }
 0x14f   : > { %937 = vmatpush3.msra.mxu1 %v652_v59 }
 0x150   : > { %938 = vmatprep.subr.mxu1 %v651_v61 }
 0x151   : > { %939 = vmatpush3.msra.mxu1 %v651_v61 }
 0x152   : > { %940 = vmatprep.subr.mxu1 %v650_v62 }
 0x153   : > { %941 = vmatpush3.msra.mxu1 %v650_v62 }
 0x154   : > { %942 = vmatprep.subr.mxu1 %v649_v0 }
 0x155   : > { %943 = vmatpush3.msra.mxu1 %v649_v0 }
 0x156   : > { %944 = vmatprep.subr.mxu1 %v648_v3 }
 0x157   : > { %945 = vmatpush3.msra.mxu1 %v648_v3 }
 0x158   : > { %946 = vmatprep.subr.mxu1 %v647_v5 }
 0x159   : > { %947 = vmatpush3.msra.mxu1 %v647_v5 }
 0x15a   : > { %948 = vmatprep.subr.mxu1 %v646_v6 }
 0x15b   : > { %949 = vmatpush3.msra.mxu1 %v646_v6 }
 0x15c   : > { %950 = vmatprep.subr.mxu1 %v645_v8 }
 0x15d   : > { %951 = vmatpush3.msra.mxu1 %v645_v8 }
 0x15e   : > { %952 = vmatprep.subr.mxu1 %v644_v11 }
 0x15f   : > { %953 = vmatpush3.msra.mxu1 %v644_v11 }
 0x160   : > { %954 = vmatprep.subr.mxu1 %v643_v13 }
 0x161   : > { %955 = vmatpush3.msra.mxu1 %v643_v13 }
 0x162   : > { %956 = vmatprep.subr.mxu1 %v642_v14 }
 0x163   : > { %957 = vmatpush3.msra.mxu1 %v642_v14 }
 0x164   : > { %958 = vmatprep.subr.mxu1 %v641_v16 }
 0x165   : > { %959 = vmatpush3.msra.mxu1 %v641_v16 }
 0x166   : > { %960 = vmatprep.subr.mxu1 %v640_v18 }
 0x167   : > { %961 = vmatpush3.msra.mxu1 %v640_v18 }
 0x168   : > { %962 = vmatprep.subr.mxu1 %v639_v19 }
 0x169   : > { %963 = vmatpush3.msra.mxu1 %v639_v19 }
 0x16a   : > { %965 = vmatmul.mubr.f32.vlgmr.msra.gmra.mxu1 %v656_v20 }
 0x22a   : > { %v966_v21 = vpop.f32.mrf.mxu1 }
 0x22b   : > { %734 = vst.msk [vmem:[%s405_s11 + $0x8] sm:$0xff] %vm732_vm0, %v966_v21 }
 0x22c   : > { %v723_v22 = vpop.f32.mrf.mxu1 }
 0x22d   : > { %733 = vst.msk [vmem:[%s405_s11] sm:$0xff] %vm732_vm0, %v723_v22 }
 0x22e PF: > { %p18_p4 = scmp.ge.s32.totalorder %s1141_s28, 4   ;;  %s1258_s23 = smov %s1064_s24 }
 0x22f   : > { %s1259_s24 = smov %s1154_s8  ;;  %s1260_s25 = smov %s1072_s0 }
 0x230   : > { %s1261_s0 = smov %s1162_s13  ;;  %s1262_s26 = smov %s1141_s28 }
 0x231   :  { %20 = sbr.rel (!%p18_p4) target bundleno = 18 (0x12), region = 161 }

// kernel: _from_to_gcn_jit.2
= control target key start
LH: loop header
LB: loop body
LE: loop exit
PB: predicated region body
PF: predicated region fallthrough
CT: control target
= control target key end

     0   :  { %s1931_s0 = inlined_call_operand.vmem [shape: s32[2], index: 0, kind: input, shape index: {}]   ;;  %s1932_s1 = inlined_call_operand.vmem [shape: bf16[256,256], index: 1, kind: input, shape index: {}]   ;;  %s1933_s2 = inlined_call_operand.vmem [shape: bf16[256,32], index: 2, kind: input, shape index: {}]   ;;  %s1934_s3 = inlined_call_operand.vmem [shape: f32[256,32], index: 3, kind: input, shape index: {}]   ;;  %s1935_s4 = inlined_call_operand.vmem [shape: f32[1,32], index: 4, kind: input, shape index: {}]   ;;  %s1936_s5 = inlined_call_operand.vmem [shape: f32[32,32], index: 5, kind: input, shape index: {}]   ;;  %s1937_s6 = inlined_call_operand.vmem [shape: f32[16,256], index: 6, kind: input, shape index: {}]   ;;  %s1938_s7 = inlined_call_operand.vmem [shape: bf16[256,32], index: 7, kind: output, shape index: {0}]   ;;  %s1939_s8 = inlined_call_operand.vmem [shape: f32[2,16,32], index: 8, kind: output, shape index: {1}]  }
   0x1   :  { %s14_s29 = sshll.u32 %s1931_s0, 4  ;;  %s15_s29 = int_to_ptr.vmem [resolvable:$true] %s14_s29 }
   0x2   :  { %s1585_s30 = scalar_lea.vmem %s15_s29, 16  ;;  %p1590_p1 = scmp.lt.s32.totalorder %s15_s29, %s15_s29 }
   0x3   :  { %p1586_p0 = scmp.ne.s32.totalorder %s15_s29, %s1585_s30  ;;  %p1591_p2 = scmp.lt.s32.totalorder %s1585_s30, %s1585_s30 }
   0x5   :  { %p1592_p3 = por %p1591_p2, %p1590_p1 }
   0x7   :  { %p1593_p4 = pnand %p1592_p3, %p1586_p0 }
   0x9   :  { %1596 = shalt.err (!%p1593_p4)  }
   0xa   :  { %s1639_s9 = smov [#allocation3]  }
   0xb   :  { %17 = dma.vmem_to_smem %s15_s29, 16, %s1639_s9, [#allocation2] }
   0xc   :  { %1617 = dma.done.wait [#allocation2], 16 }
   0xd   :  { %1618 = vsyncadd [#allocation2], 4294967280 }
   0xe   :  { %19 = sfence }
   0xf   :  { %s1688_s10 = smov 0   ;;  %s1690_s11 = smov 0  }
  0x10   :  { %s1692_s12 = smov 0   ;;  %s1694_s0 = smov 0  }
  0x11   :  { %s1696_s13 = smov 0  }
  0x12 LB: > { %s1714_s14 = sadd.s32 4294967295, %s1637_s13   ;;  %s1717_s15 = sadd.s32 1, %s1637_s13   ;;  %s1637_s13 = sphi %s1696_s13, %s1945_s13   ;;  %s1633_s0 = sphi %s1694_s0, %s1944_s0   ;;  %s1629_s12 = sphi %s1692_s12, %s1943_s12   ;;  %s1625_s11 = sphi %s1690_s11, %s1942_s11   ;;  %s1621_s10 = sphi %s1688_s10, %s1941_s10  }
  0x13   : > { %s29_s16 = sld [smem:[#allocation3 + %s1637_s13]]  ;;  %s31_s17 = ssub.s32 %s1637_s13, %s1717_s15 }
  0x14   : > { %s30_s18 = sld [smem:[#allocation3 + %s1717_s15]]  ;;  %p43_p5 = scmp.ne.s32.totalorder %s1633_s0, %s1629_s12 }
  0x15   : > { %p44_p6 = scmp.eq.s32.totalorder %s1637_s13, 0  ;;  %p156_p7 = scmp.eq.s32.totalorder %s31_s17, 0 }
  0x16   : > { %s158_s19 = sadd.s32 1, %s1625_s11  ;;  %p165_p9 = scmp.ne.s32.totalorder %s1625_s11, %s1621_s10 }
  0x17   : > { %p45_p8 = por %p44_p6, %p43_p5  ;;  %s36_s24 = sadd.s32 1, %s1633_s0 }
  0x18   : > { %s1730_s20 = scalar_select %p156_p7, %s1625_s11, %s158_s19  }
  0x19   : > { %p1732_p10 = por %p165_p9, %p44_p6  ;;  %p1288_p12 = scmp.ge.s32.totalorder %s1637_s13, 2 }
  0x1a   : > { %s32_s22 = ssub.s32 %s29_s16, %s30_s18 }
  0x1b   : > { %s33_s23 = sor.u32 %s32_s22, %s31_s17  ;;  %249 = sbr.rel (%p1288_p12) target bundleno = 57 (0x39), region = 24 }
  0x1c   : > { %p34_p11 = scmp.eq.s32.totalorder %s33_s23, 0 }
  0x1e   : > { %s1738_s25 = scalar_select %p34_p11, %s1633_s0, %s36_s24  }
  0x20   : > { %252 = sbr.rel (!%p45_p8) target bundleno = 52 (0x34), region = 28  ;;  %s257_s26 = sld [smem:[#allocation3 + %s1637_s13]] (%p45_p8) }
  0x21   : > { %s254_s27 = sand.u32 (%p45_p8), 1, %s1633_s0   ;;  %s1357_s28 = sshll.u32 (%p45_p8), %s1637_s13, 5 }
  0x22   : > { %s1289_s29 = sshll.u32 (%p45_p8), %s254_s27, 6 }
  0x23   : > { %s256_s18 = scalar_lea.vmem (%p45_p8), [#allocation4], %s1289_s29 }
  0x26   : > { %s260_s30 = sadd.s32 %s1357_s28, %s257_s26 }
  0x27   : > { %s1292_s9 = sshll.u32 %s260_s30, 2 }
  0x28   : > { %s1747_s17 = scalar_lea.vmem %s1932_s1, %s1292_s9 }
  0x29   : > { %v279_v0 = vld [vmem:[%s1747_s17] sm:$0xf]  ;;  %v281_v1 = vld [vmem:[%s1747_s17 + $0x8] sm:$0xf]  ;;  %v283_v2 = vld [vmem:[%s1747_s17 + $0x10] sm:$0xf] }
  0x2a   : > { %280 = vst [vmem:[%s256_s18] sm:$0xf] %v279_v0  ;;  %282 = vst [vmem:[%s256_s18 + $0x4] sm:$0xf] %v281_v1  ;;  %v285_v3 = vld [vmem:[%s1747_s17 + $0x18] sm:$0xf] }
  0x2b   : > { %284 = vst [vmem:[%s256_s18 + $0x8] sm:$0xf] %v283_v2  ;;  %v287_v4 = vld [vmem:[%s1747_s17 + $0x20] sm:$0xf]  ;;  %v289_v5 = vld [vmem:[%s1747_s17 + $0x28] sm:$0xf] }
  0x2c   : > { %286 = vst [vmem:[%s256_s18 + $0xc] sm:$0xf] %v285_v3  ;;  %288 = vst [vmem:[%s256_s18 + $0x10] sm:$0xf] %v287_v4  ;;  %v291_v6 = vld [vmem:[%s1747_s17 + $0x30] sm:$0xf] }
  0x2d   : > { %290 = vst [vmem:[%s256_s18 + $0x14] sm:$0xf] %v289_v5  ;;  %v293_v7 = vld [vmem:[%s1747_s17 + $0x38] sm:$0xf]  ;;  %v295_v8 = vld [vmem:[%s1747_s17 + $0x40] sm:$0xf] }
  0x2e   : > { %292 = vst [vmem:[%s256_s18 + $0x18] sm:$0xf] %v291_v6  ;;  %294 = vst [vmem:[%s256_s18 + $0x1c] sm:$0xf] %v293_v7  ;;  %v297_v9 = vld [vmem:[%s1747_s17 + $0x48] sm:$0xf] }
  0x2f   : > { %296 = vst [vmem:[%s256_s18 + $0x20] sm:$0xf] %v295_v8  ;;  %v299_v10 = vld [vmem:[%s1747_s17 + $0x50] sm:$0xf]  ;;  %v301_v11 = vld [vmem:[%s1747_s17 + $0x58] sm:$0xf] }
  0x30   : > { %298 = vst [vmem:[%s256_s18 + $0x24] sm:$0xf] %v297_v9  ;;  %300 = vst [vmem:[%s256_s18 + $0x28] sm:$0xf] %v299_v10  ;;  %v303_v12 = vld [vmem:[%s1747_s17 + $0x60] sm:$0xf] }
  0x31   : > { %302 = vst [vmem:[%s256_s18 + $0x2c] sm:$0xf] %v301_v11  ;;  %v305_v13 = vld [vmem:[%s1747_s17 + $0x68] sm:$0xf]  ;;  %v307_v14 = vld [vmem:[%s1747_s17 + $0x70] sm:$0xf] }
  0x32   : > { %304 = vst [vmem:[%s256_s18 + $0x30] sm:$0xf] %v303_v12  ;;  %306 = vst [vmem:[%s256_s18 + $0x34] sm:$0xf] %v305_v13  ;;  %v309_v15 = vld [vmem:[%s1747_s17 + $0x78] sm:$0xf] }
  0x33   : > { %308 = vst [vmem:[%s256_s18 + $0x38] sm:$0xf] %v307_v14  ;;  %310 = vst [vmem:[%s256_s18 + $0x3c] sm:$0xf] %v309_v15 }
  0x34 PF: > { %386 = sbr.rel (!%p1732_p10) target bundleno = 57 (0x39), region = 77  ;;  %s388_s22 = sand.u32 (%p1732_p10), 1, %s1625_s11  }
  0x35   : > { %s1294_s23 = sshll.u32 (%p1732_p10), %s1637_s13, 3  ;;  %s1293_s24 = sshll.u32 (%p1732_p10), %s388_s22, 4 }
  0x36   : > { %s392_s28 = scalar_lea.vmem (%p1732_p10), %s1937_s6, %s1294_s23  ;;  %s390_s29 = scalar_lea.vmem (%p1732_p10), [#allocation5], %s1293_s24 }
  0x37   : > { %v423_v16 = vld [vmem:[%s392_s28] sm:$0xff] (%p1732_p10)  ;;  %v425_v17 = vld [vmem:[%s392_s28 + $0x10] sm:$0xff] (%p1732_p10) }
  0x38   : > { %424 = vst [vmem:[%s390_s29] sm:$0xff] (%p1732_p10), %v423_v16  ;;  %426 = vst [vmem:[%s390_s29 + $0x8] sm:$0xff] (%p1732_p10), %v425_v17 }
  0x39 PF: > { %p1295_p13 = scmp.ge.s32.totalorder %s1637_s13, 1  ;;  %p431_p0 = scmp.lt.s32.totalorder %s1637_s13, 3 }
  0x3b   : > { %p432_p1 = pnand %p1295_p13, %p431_p0 }
  0x3c   : > { %s498_s21 = sld [smem:[#allocation3 + %s1714_s14]] (!%p432_p1)  ;;  %s438_s30 = sand.u32 (!%p432_p1), 1, %s1629_s12  }
  0x3d   : > { %435 = sbr.rel (%p432_p1) target bundleno = 558 (0x22e), region = 115  ;;  %s1296_s9 = sshll.u32 (!%p432_p1), %s438_s30, 6 }
  0x3e   : > { %s1776_s19 = scalar_lea.vmem (!%p432_p1), [#allocation4], %s1296_s9  ;;  %p518_p4 = scmp.lt.s32.totalorder (!%p432_p1), %s1714_s14, 1 }
  0x42   : > { %v1577_v18 = vld [vmem:[%s1776_s19] sm:$0xff]   ;;  %s1298_s16 = sshll.u32 %s498_s21, 4  ;;  %v1578_v27 = vld [vmem:[%s1776_s19 + $0x8] sm:$0xff]   ;;  %v1579_v28 = vld [vmem:[%s1776_s19 + $0x10] sm:$0xff]   ;;  %vm792_vm0 = vcmask 261120   ;;  %vm1050_vm1 = vcmask 257024  }
  0x43   : > { %1445 = vmatprep.mubr.bf16.mxu0 %v1577_v18  ;;  %p500_p2 = scmp.lt.s32.totalorder %s1298_s16, 31  ;;  %v1580_v29 = vld [vmem:[%s1776_s19 + $0x18] sm:$0xff]   ;;  %v1581_v30 = vld [vmem:[%s1776_s19 + $0x20] sm:$0xff]   ;;  %v1582_v31 = vld [vmem:[%s1776_s19 + $0x28] sm:$0xff]  }
  0x44   : > { %v1583_v32 = vld [vmem:[%s1776_s19 + $0x30] sm:$0xff]   ;;  %v1584_v33 = vld [vmem:[%s1776_s19 + $0x38] sm:$0xff]   ;;  %v773_v36 = vld [vmem:[%s1936_s5 + $0x8] sm:$0xff]  ;;  %s445_s19 = sand.u32 1, %s1621_s10  }
  0x45   : > { %s1947_s16 = smov (!%p500_p2, %s1298_s16), 31  ;;  %v775_v34 = vld [vmem:[%s1936_s5 + $0x18] sm:$0xff]  ;;  %v774_v35 = vld [vmem:[%s1936_s5 + $0x10] sm:$0xff]  ;;  %v772_v37 = vld [vmem:[%s1936_s5] sm:$0xff] }
  0x46   : > { %s1299_s17 = sshll.u32 %s1947_s16, 2  ;;  %1461 = vmatprep.subr.mxu1 %v775_v34  ;;  %v1306_v39 = vld [vmem:[%s1935_s4] ss:$0 sm:$0xff]  ;;  %s1832_s16 = sshll.u32 %s445_s19, 4 }
  0x47   : > { %s503_s13 = scalar_lea.vmem %s1933_s2, %s1299_s17  ;;  %1462 = vmatpush3.msra.mxu1 %v775_v34  ;;  %s447_s10 = scalar_lea.vmem [#allocation5], %s1832_s16 }
  0x48   : > { %v1569_v19 = vld [vmem:[%s503_s13 + $0x38] sm:$0xff]   ;;  %v1570_v20 = vld [vmem:[%s503_s13 + $0x30] sm:$0xff]   ;;  %v1571_v21 = vld [vmem:[%s503_s13 + $0x28] sm:$0xff]   ;;  %1463 = vmatprep.subr.mxu1 %v774_v35  ;;  %s1300_s17 = sshll.u32 %s1714_s14, 4  ;;  %s1951_s14 = smov (!%p518_p4, %s1714_s14), 1 }
  0x49   : > { %1429 = vmatprep.subr.bf16.mxu0 %v1569_v19  ;;  %v1572_v22 = vld [vmem:[%s503_s13 + $0x20] sm:$0xff]   ;;  %v1573_v23 = vld [vmem:[%s503_s13 + $0x18] sm:$0xff]   ;;  %v1574_v24 = vld [vmem:[%s503_s13 + $0x10] sm:$0xff]   ;;  %1464 = vmatpush3.msra.mxu1 %v774_v35  ;;  %p507_p3 = scmp.lt.s32.totalorder %s1300_s17, 31  ;;  %s1358_s28 = sshll.u32 %s1951_s14, 4 }
  0x4a   : > { %1430 = vmatpush3.bf16.msra.mxu0 %v1569_v19  ;;  %v1575_v25 = vld [vmem:[%s503_s13 + $0x8] sm:$0xff]   ;;  %v1576_v26 = vld [vmem:[%s503_s13] sm:$0xff]   ;;  %1465 = vmatprep.subr.mxu1 %v773_v36  ;;  %s522_s30 = scalar_lea.vmem %s1939_s8, %s1358_s28 }
  0x4b   : > { %1431 = vmatprep.subr.bf16.mxu0 %v1570_v20  ;;  %1466 = vmatpush3.msra.mxu1 %v773_v36  ;;  %s1949_s17 = smov (!%p507_p3, %s1300_s17), 31 }
  0x4c   : > { %1467 = vmatprep.subr.mxu1 %v772_v37  ;;  %s1301_s18 = sshll.u32 %s1949_s17, 3  ;;  %s1303_s23 = sshll.u32 %s1949_s17, 2 }
  0x4d   : > { %1468 = vmatpush3.msra.mxu1 %v772_v37  ;;  %s1853_s12 = scalar_lea.vmem %s1934_s3, %s1301_s18  ;;  %s1860_s27 = scalar_lea.vmem %s1938_s7, %s1303_s23 }
  0x4e   : > { %1432 = vmatpush3.bf16.msra.mxu0 %v1570_v20  ;;  %v778_v34 = vld [vmem:[%s1853_s12 + $0x10] sm:$0xff] }
  0x4f   : > { %1433 = vmatprep.subr.bf16.mxu0 %v1571_v21 }
  0x52   : > { %1434 = vmatpush3.bf16.msra.mxu0 %v1571_v21 }
  0x53   : > { %1435 = vmatprep.subr.bf16.mxu0 %v1572_v22 }
  0x56   : > { %1436 = vmatpush3.bf16.msra.mxu0 %v1572_v22 }
  0x57   : > { %1437 = vmatprep.subr.bf16.mxu0 %v1573_v23 }
  0x5a   : > { %1438 = vmatpush3.bf16.msra.mxu0 %v1573_v23  ;;  %v1067_v23 = vld [vmem:[%s447_s10] sm:$0xff] }
  0x5b   : > { %1439 = vmatprep.subr.bf16.mxu0 %v1574_v24 }
  0x5e   : > { %1440 = vmatpush3.bf16.msra.mxu0 %v1574_v24  ;;  %v1068_v24 = vld [vmem:[%s447_s10 + $0x8] sm:$0xff] }
  0x5f   : > { %1441 = vmatprep.subr.bf16.mxu0 %v1575_v25 }
  0x62   : > { %1442 = vmatpush3.bf16.msra.mxu0 %v1575_v25  ;;  %v777_v25 = vld [vmem:[%s1853_s12 + $0x8] sm:$0xff] }
  0x63   : > { %1443 = vmatprep.subr.bf16.mxu0 %v1576_v26 }
  0x66   : > { %1444 = vmatpush3.bf16.msra.mxu0 %v1576_v26 }
  0x69   : > { %1446 = vmatmul.mubr.bf16.vlgmr.msra.gmra.mxu0 %v1578_v27  ;;  %v776_v27 = vld [vmem:[%s1853_s12] sm:$0xff] }
  0x6a   : > { %1449 = vmatprep.mubr.bf16.mxu0 %v1579_v28 }
  0x71   : > { %1450 = vmatmul.mubr.bf16.gmra.mxu0 %v1580_v29 }
  0x72   : > { %1453 = vmatprep.mubr.bf16.mxu0 %v1581_v30  ;;  %v779_v30 = vld [vmem:[%s1853_s12 + $0x18] sm:$0xff] }
  0x79   : > { %1454 = vmatmul.mubr.bf16.gmra.mxu0 %v1582_v31 }
  0x7a   : > { %1457 = vmatprep.mubr.bf16.mxu0 %v1583_v32 }
  0x81   : > { %1458 = vmatmul.mubr.bf16.gmra.mxu0 %v1584_v33 }
 0x129   : > { %v1447_v38 = vpop.f32.mrf.mxu0 }
 0x12a   : > { %v702_v44 = vadd.f32 %v1447_v38, %v1306_v39  ;;  %v781_v38 = vld [vmem:[%s1853_s12 + $0x28] sm:$0xff] }
 0x12b   : > { %v693_v40 = vpop.f32.mrf.mxu0 }
 0x12c   : > { %v694_v41 = vadd.f32 %v1306_v39, %v693_v40  ;;  %v1810_v50 = vmax.f32 %v702_v44, 0.0 }
 0x12d   : > { %v1448_v42 = vpop.f32.mrf.mxu0 }
 0x12e   : > { %v1804_v43 = vmax.f32 %v694_v41, 0.0  ;;  %v705_v48 = vadd.f32 %v1448_v42, %v1306_v39  ;;  %v780_v42 = vld [vmem:[%s1853_s12 + $0x20] sm:$0xff] }
 0x12f   : > { %v696_v45 = vpop.f32.mrf.mxu0 }
 0x130   : > { %v697_v46 = vadd.f32 %v1306_v39, %v696_v45  ;;  %1469 = vmatprep.mubr.msk.f32.mxu1 %vm792_vm0, %v1804_v43  ;;  %v1816_v54 = vmax.f32 %v705_v48, 0.0 }
 0x131   : > { %v1451_v47 = vpop.f32.mrf.mxu0 }
 0x132   : > { %v1808_v49 = vmax.f32 %v697_v46, 0.0  ;;  %v718_v56 = vadd.f32 %v1451_v47, %v1306_v39  ;;  %v783_v46 = vld [vmem:[%s1853_s12 + $0x38] sm:$0xff] }
 0x133   : > { %v709_v51 = vpop.f32.mrf.mxu0 }
 0x134   : > { %v710_v52 = vadd.f32 %v1306_v39, %v709_v51  ;;  %1470 = vmatmul.mubr.msk.f32.vlgmr.msra.gmra.mxu1 %vm792_vm0, %v1808_v49  ;;  %v762_v62 = vmax.f32 %v718_v56, 0.0 }
 0x135   : > { %v1452_v53 = vpop.f32.mrf.mxu0  ;;  %1472 = vmatprep.mubr.msk.f32.mxu1 %vm792_vm0, %v1810_v50 }
 0x136   : > { %v1818_v55 = vmax.f32 %v710_v52, 0.0  ;;  %v721_v60 = vadd.f32 %v1452_v53, %v1306_v39 }
 0x137   : > { %v712_v57 = vpop.f32.mrf.mxu0 }
 0x138   : > { %v713_v58 = vadd.f32 %v1306_v39, %v712_v57  ;;  %1473 = vmatmul.mubr.msk.f32.gmra.mxu1 %vm792_vm0, %v1816_v54  ;;  %v763_v2 = vmax.f32 %v721_v60, 0.0 }
 0x139   : > { %v1455_v59 = vpop.f32.mrf.mxu0  ;;  %1475 = vmatprep.mubr.msk.f32.mxu1 %vm792_vm0, %v1818_v55 }
 0x13a   : > { %v761_v61 = vmax.f32 %v713_v58, 0.0  ;;  %v734_v4 = vadd.f32 %v1455_v59, %v1306_v39  ;;  %v784_v58 = vld [vmem:[%s1853_s12 + $0x40] sm:$0xff] }
 0x13b   : > { %v725_v63 = vpop.f32.mrf.mxu0 }
 0x13c   : > { %v726_v0 = vadd.f32 %v1306_v39, %v725_v63  ;;  %1476 = vmatmul.mubr.msk.f32.gmra.mxu1 %vm792_vm0, %v761_v61  ;;  %v766_v10 = vmax.f32 %v734_v4, 0.0 }
 0x13d   : > { %v1456_v1 = vpop.f32.mrf.mxu0  ;;  %1478 = vmatprep.mubr.msk.f32.mxu1 %vm792_vm0, %v762_v62 }
 0x13e   : > { %v764_v3 = vmax.f32 %v726_v0, 0.0  ;;  %v737_v8 = vadd.f32 %v1456_v1, %v1306_v39 }
 0x13f   : > { %v728_v5 = vpop.f32.mrf.mxu0 }
 0x140   : > { %v729_v6 = vadd.f32 %v1306_v39, %v728_v5  ;;  %1479 = vmatmul.mubr.msk.f32.gmra.mxu1 %vm792_vm0, %v763_v2  ;;  %v767_v14 = vmax.f32 %v737_v8, 0.0 }
 0x141   : > { %v1459_v7 = vpop.f32.mrf.mxu0  ;;  %1481 = vmatprep.mubr.msk.f32.mxu1 %vm792_vm0, %v764_v3 }
 0x142   : > { %v765_v9 = vmax.f32 %v729_v6, 0.0  ;;  %v750_v15 = vadd.f32 %v1459_v7, %v1306_v39  ;;  %v789_v6 = vld [vmem:[%s1853_s12 + $0x68] sm:$0xff] }
 0x143   : > { %v741_v11 = vpop.f32.mrf.mxu0 }
 0x144   : > { %v742_v12 = vadd.f32 %v1306_v39, %v741_v11  ;;  %1482 = vmatmul.mubr.msk.f32.gmra.mxu1 %vm792_vm0, %v765_v9  ;;  %v770_v21 = vmax.f32 %v750_v15, 0.0 }
 0x145   : > { %v1460_v13 = vpop.f32.mrf.mxu0  ;;  %1484 = vmatprep.mubr.msk.f32.mxu1 %vm792_vm0, %v766_v10 }
 0x146   : > { %v768_v16 = vmax.f32 %v742_v12, 0.0  ;;  %v753_v17 = vadd.f32 %v1460_v13, %v1306_v39 }
 0x147   : > { %v744_v18 = vpop.f32.mrf.mxu0 }
 0x148   : > { %v771_v19 = vmax.f32 %v753_v17, 0.0  ;;  %v745_v20 = vadd.f32 %v1306_v39, %v744_v18  ;;  %1485 = vmatmul.mubr.msk.f32.gmra.mxu1 %vm792_vm0, %v767_v14  ;;  %v790_v18 = vld [vmem:[%s1853_s12 + $0x70] sm:$0xff] }
 0x149   : > { %1487 = vmatprep.mubr.msk.f32.mxu1 %vm792_vm0, %v768_v16 }
 0x14a   : > { %v769_v22 = vmax.f32 %v745_v20, 0.0  ;;  %1493 = vmatprep.subr.mxu1 %v771_v19 }
 0x14b   : > { %1494 = vmatpush3.msra.mxu1 %v771_v19 }
 0x14c   : > { %1488 = vmatmul.mubr.msk.f32.gmra.mxu1 %vm792_vm0, %v769_v22  ;;  %1495 = vmatprep.subr.mxu1 %v770_v21 }
 0x14d   : > { %1490 = vmatprep.mubr.msk.f32.mxu1 %vm792_vm0, %v770_v21  ;;  %1496 = vmatpush3.msra.mxu1 %v770_v21 }
 0x14e   : > { %1497 = vmatprep.subr.mxu1 %v769_v22 }
 0x14f   : > { %1498 = vmatpush3.msra.mxu1 %v769_v22 }
 0x150   : > { %1491 = vmatmul.mubr.msk.f32.gmra.mxu1 %vm792_vm0, %v771_v19  ;;  %1499 = vmatprep.subr.mxu1 %v768_v16 }
 0x151   : > { %1500 = vmatpush3.msra.mxu1 %v768_v16  ;;  %1525 = vmatprep.mubr.f32.mxu1 %v1067_v23 }
 0x152   : > { %1501 = vmatprep.subr.mxu1 %v767_v14 }
 0x153   : > { %1502 = vmatpush3.msra.mxu1 %v767_v14  ;;  %v791_v14 = vld [vmem:[%s1853_s12 + $0x78] sm:$0xff] }
 0x154   : > { %1503 = vmatprep.subr.mxu1 %v766_v10 }
 0x155   : > { %1504 = vmatpush3.msra.mxu1 %v766_v10  ;;  %v788_v10 = vld [vmem:[%s1853_s12 + $0x60] sm:$0xff] }
 0x156   : > { %1505 = vmatprep.subr.mxu1 %v765_v9 }
 0x157   : > { %1506 = vmatpush3.msra.mxu1 %v765_v9 }
 0x158   : > { %1507 = vmatprep.subr.mxu1 %v764_v3 }
 0x159   : > { %1508 = vmatpush3.msra.mxu1 %v764_v3 }
 0x15a   : > { %1509 = vmatprep.subr.mxu1 %v763_v2 }
 0x15b   : > { %1510 = vmatpush3.msra.mxu1 %v763_v2  ;;  %v786_v2 = vld [vmem:[%s1853_s12 + $0x50] sm:$0xff] }
 0x15c   : > { %1511 = vmatprep.subr.mxu1 %v762_v62 }
 0x15d   : > { %1512 = vmatpush3.msra.mxu1 %v762_v62  ;;  %v787_v62 = vld [vmem:[%s1853_s12 + $0x58] sm:$0xff] }
 0x15e   : > { %1513 = vmatprep.subr.mxu1 %v761_v61 }
 0x15f   : > { %1514 = vmatpush3.msra.mxu1 %v761_v61 }
 0x160   : > { %1515 = vmatprep.subr.mxu1 %v1818_v55 }
 0x161   : > { %1516 = vmatpush3.msra.mxu1 %v1818_v55 }
 0x162   : > { %1517 = vmatprep.subr.mxu1 %v1816_v54 }
 0x163   : > { %1518 = vmatpush3.msra.mxu1 %v1816_v54  ;;  %v785_v54 = vld [vmem:[%s1853_s12 + $0x48] sm:$0xff] }
 0x164   : > { %1519 = vmatprep.subr.mxu1 %v1810_v50 }
 0x165   : > { %1520 = vmatpush3.msra.mxu1 %v1810_v50  ;;  %v782_v50 = vld [vmem:[%s1853_s12 + $0x30] sm:$0xff] }
 0x166   : > { %1521 = vmatprep.subr.mxu1 %v1808_v49 }
 0x167   : > { %1522 = vmatpush3.msra.mxu1 %v1808_v49 }
 0x168   : > { %1523 = vmatprep.subr.mxu1 %v1804_v43 }
 0x169   : > { %1524 = vmatpush3.msra.mxu1 %v1804_v43 }
 0x16a   : > { %1526 = vmatmul.mubr.f32.vlgmr.msra.gmra.mxu1 %v1068_v24 }
 0x1f4   : > { %v1471_v26 = vpop.f32.mrf.mxu1 }
 0x1f5   : > { %v913_v28 = vadd.f32 %v1471_v26, %v777_v25 }
 0x1f6   : > { %v907_v29 = vpop.f32.mrf.mxu1 }
 0x1f7   : > { %v1360_v31 = vpack.c.bf16 %v913_v28, %v913_v28  ;;  %v908_v32 = vadd.f32 %v907_v29, %v776_v27 }
 0x1f8   : > { %v1474_v33 = vpop.f32.mrf.mxu1 }
 0x1f9   : > { %1052 = vst.msk [vmem:[%s1860_s27 + $0x4] sm:$0xf] %vm1050_vm1, %v1360_v31  ;;  %v1359_v35 = vpack.c.bf16 %v908_v32, %v908_v32  ;;  %v923_v36 = vadd.f32 %v1474_v33, %v779_v30 }
 0x1fa   : > { %v917_v37 = vpop.f32.mrf.mxu1 }
 0x1fb   : > { %1051 = vst.msk [vmem:[%s1860_s27] sm:$0xf] %vm1050_vm1, %v1359_v35  ;;  %v1362_v39 = vpack.c.bf16 %v923_v36, %v923_v36  ;;  %v918_v40 = vadd.f32 %v917_v37, %v778_v34 }
 0x1fc   : > { %v1477_v41 = vpop.f32.mrf.mxu1 }
 0x1fd   : > { %1054 = vst.msk [vmem:[%s1860_s27 + $0xc] sm:$0xf] %vm1050_vm1, %v1362_v39  ;;  %v1361_v43 = vpack.c.bf16 %v918_v40, %v918_v40  ;;  %v933_v44 = vadd.f32 %v1477_v41, %v781_v38 }
 0x1fe   : > { %v927_v45 = vpop.f32.mrf.mxu1 }
 0x1ff   : > { %1053 = vst.msk [vmem:[%s1860_s27 + $0x8] sm:$0xf] %vm1050_vm1, %v1361_v43  ;;  %v1364_v47 = vpack.c.bf16 %v933_v44, %v933_v44  ;;  %v928_v48 = vadd.f32 %v927_v45, %v780_v42 }
 0x200   : > { %v1480_v49 = vpop.f32.mrf.mxu1 }
 0x201   : > { %1056 = vst.msk [vmem:[%s1860_s27 + $0x14] sm:$0xf] %vm1050_vm1, %v1364_v47  ;;  %v1363_v51 = vpack.c.bf16 %v928_v48, %v928_v48  ;;  %v943_v52 = vadd.f32 %v1480_v49, %v783_v46 }
 0x202   : > { %v937_v53 = vpop.f32.mrf.mxu1 }
 0x203   : > { %1055 = vst.msk [vmem:[%s1860_s27 + $0x10] sm:$0xf] %vm1050_vm1, %v1363_v51  ;;  %v1366_v55 = vpack.c.bf16 %v943_v52, %v943_v52  ;;  %v938_v56 = vadd.f32 %v937_v53, %v782_v50 }
 0x204   : > { %v1483_v57 = vpop.f32.mrf.mxu1 }
 0x205   : > { %1058 = vst.msk [vmem:[%s1860_s27 + $0x1c] sm:$0xf] %vm1050_vm1, %v1366_v55  ;;  %v1365_v59 = vpack.c.bf16 %v938_v56, %v938_v56  ;;  %v953_v60 = vadd.f32 %v1483_v57, %v785_v54 }
 0x206   : > { %v947_v61 = vpop.f32.mrf.mxu1 }
 0x207   : > { %1057 = vst.msk [vmem:[%s1860_s27 + $0x18] sm:$0xf] %vm1050_vm1, %v1365_v59  ;;  %v1368_v63 = vpack.c.bf16 %v953_v60, %v953_v60  ;;  %v948_v0 = vadd.f32 %v947_v61, %v784_v58 }
 0x208   : > { %v1486_v1 = vpop.f32.mrf.mxu1 }
 0x209   : > { %1060 = vst.msk [vmem:[%s1860_s27 + $0x24] sm:$0xf] %vm1050_vm1, %v1368_v63  ;;  %v1367_v3 = vpack.c.bf16 %v948_v0, %v948_v0  ;;  %v963_v4 = vadd.f32 %v1486_v1, %v787_v62 }
 0x20a   : > { %v957_v5 = vpop.f32.mrf.mxu1 }
 0x20b   : > { %1059 = vst.msk [vmem:[%s1860_s27 + $0x20] sm:$0xf] %vm1050_vm1, %v1367_v3  ;;  %v1370_v7 = vpack.c.bf16 %v963_v4, %v963_v4  ;;  %v958_v8 = vadd.f32 %v957_v5, %v786_v2 }
 0x20c   : > { %v1489_v9 = vpop.f32.mrf.mxu1 }
 0x20d   : > { %1062 = vst.msk [vmem:[%s1860_s27 + $0x2c] sm:$0xf] %vm1050_vm1, %v1370_v7  ;;  %v1369_v11 = vpack.c.bf16 %v958_v8, %v958_v8  ;;  %v973_v12 = vadd.f32 %v1489_v9, %v789_v6 }
 0x20e   : > { %v967_v13 = vpop.f32.mrf.mxu1 }
 0x20f   : > { %1061 = vst.msk [vmem:[%s1860_s27 + $0x28] sm:$0xf] %vm1050_vm1, %v1369_v11  ;;  %v1372_v15 = vpack.c.bf16 %v973_v12, %v973_v12  ;;  %v968_v16 = vadd.f32 %v967_v13, %v788_v10 }
 0x210   : > { %v1492_v17 = vpop.f32.mrf.mxu1 }
 0x211   : > { %1064 = vst.msk [vmem:[%s1860_s27 + $0x34] sm:$0xf] %vm1050_vm1, %v1372_v15  ;;  %v1371_v19 = vpack.c.bf16 %v968_v16, %v968_v16  ;;  %v983_v20 = vadd.f32 %v1492_v17, %v791_v14 }
 0x212   : > { %v977_v21 = vpop.f32.mrf.mxu1 }
 0x213   : > { %1063 = vst.msk [vmem:[%s1860_s27 + $0x30] sm:$0xf] %vm1050_vm1, %v1371_v19  ;;  %v1374_v22 = vpack.c.bf16 %v983_v20, %v983_v20  ;;  %v978_v23 = vadd.f32 %v977_v21, %v790_v18 }
 0x215   : > { %1066 = vst.msk [vmem:[%s1860_s27 + $0x3c] sm:$0xf] %vm1050_vm1, %v1374_v22  ;;  %v1373_v24 = vpack.c.bf16 %v978_v23, %v978_v23 }
 0x217   : > { %1065 = vst.msk [vmem:[%s1860_s27 + $0x38] sm:$0xf] %vm1050_vm1, %v1373_v24 }
 0x22a   : > { %v1527_v25 = vpop.f32.mrf.mxu1 }
 0x22b   : > { %1145 = vst.msk [vmem:[%s522_s30 + $0x8] sm:$0xff] %vm792_vm0, %v1527_v25 }
 0x22c   : > { %v1135_v26 = vpop.f32.mrf.mxu1 }
 0x22d   : > { %1144 = vst.msk [vmem:[%s522_s30] sm:$0xff] %vm792_vm0, %v1135_v26 }
 0x22e PF: > { %p22_p5 = scmp.ge.s32.totalorder %s1717_s15, 4   ;;  %s1941_s10 = smov %s1625_s11 }
 0x22f   : > { %s1942_s11 = smov %s1730_s20  ;;  %s1943_s12 = smov %s1633_s0 }
 0x230   : > { %s1944_s0 = smov %s1738_s25  ;;  %s1945_s13 = smov %s1717_s15 }
 0x231   :  { %24 = sbr.rel (!%p22_p5) target bundleno = 18 (0x12), region = 184 }

</bundles_post_ra>
